<compile_context>
chip_gen: v7x
topology: tpu7x:2x2x1
jax: 0.10.0
libtpu: 0.0.40
codegen_flags: <defaults>
</compile_context>

<pallas_src>
import functools

import jax
import jax.numpy as jnp
from jax.experimental import pallas as pl
from jax.experimental.pallas import tpu as pltpu

_LANE = 128
_BF16_SUBLANE = 16  # bf16 packs 16 rows per vreg sublane group


def _round_up(n, m):
    return ((n + m - 1) // m) * m


def _mlp_kernel(num_layers, x_ref, w0_ref, *rest):
    """Whole MLP on one (tb, F_pad) batch tile; packed params stay VMEM-resident across grid steps.

    rest = ([w_stack,] shifts, wf, bf, out) with shapes
      w_stack: (L, H_pad, H_pad) bf16    shifts: (L+1, 1, H_pad) f32
      wf:      (H_pad, T_pad)   bf16     bf:     (1, T_pad)      f32
    """
    if num_layers > 0:
        w_stack_ref, shifts_ref, wf_ref, bf_ref, out_ref = rest
    else:
        w_stack_ref = None
        shifts_ref, wf_ref, bf_ref, out_ref = rest

    def hidden_layer(h, w, l):
        # Bias-free Linear with the BN scale pre-folded into the bf16 weight columns (MXU),
        # then folded BN shift + ReLU in f32 (Dropout is identity in eval mode).
        acc = jnp.dot(h, w, preferred_element_type=jnp.float32)
        return jnp.maximum(acc + shifts_ref[l], 0.0).astype(jnp.bfloat16)

    h = hidden_layer(x_ref[...], w0_ref[...], 0)
    for l in range(num_layers):
        h = hidden_layer(h, w_stack_ref[l], l + 1)

    out = jnp.dot(h, wf_ref[...], preferred_element_type=jnp.float32) + bf_ref[...]
    out_ref[...] = out.astype(out_ref.dtype)


def init_params(key, num_features, num_targets, num_layers, hidden_size):
    """Deterministic params mirroring the PyTorch __init__ (xavier_normal_ weights, default BN/bias)."""
    hidden = []
    dims = [(num_features, hidden_size)] + [(hidden_size, hidden_size)] * num_layers

    def xavier_normal(k, fan_in, fan_out):
        std = jnp.sqrt(2.0 / (fan_in + fan_out))
        # stored as (in, out) = transpose of PyTorch's (out, in)
        return jax.random.normal(k, (fan_in, fan_out), dtype=jnp.float32) * std

    for fan_in, fan_out in dims:
        key, k = jax.random.split(key)
        w = xavier_normal(k, fan_in, fan_out)
        gamma = jnp.ones((fan_out,), jnp.float32)
        beta = jnp.zeros((fan_out,), jnp.float32)
        running_mean = jnp.zeros((fan_out,), jnp.float32)
        running_var = jnp.ones((fan_out,), jnp.float32)
        hidden.append((w, gamma, beta, running_mean, running_var))

    key, kw, kb = jax.random.split(key, 3)
    wf = xavier_normal(kw, hidden_size, num_targets)
    bound = 1.0 / jnp.sqrt(jnp.float32(hidden_size))  # PyTorch default bias init
    bf = jax.random.uniform(kb, (num_targets,), jnp.float32, -bound, bound)
    return {"hidden": hidden, "final": (wf, bf)}


def prepare_params(raw, eps=1e-5):
    """Fold eval-mode BN into the weights, pad to 128 lanes, cast weights to bf16, pack per-layer
    params into a few stacked operands."""
    folded = []
    for w, gamma, beta, mean, var in raw["hidden"]:
        scale = gamma / jnp.sqrt(var + eps)
        shift = beta - mean * scale
        folded.append((w * scale[None, :], shift))  # BN scale folded into weight columns

    num_features = folded[0][0].shape[0]
    hidden_size = folded[0][0].shape[1]
    F_pad = _round_up(num_features, _LANE)
    H_pad = _round_up(hidden_size, _LANE)

    w0 = (jnp.zeros((F_pad, H_pad), jnp.float32)
          .at[:num_features, :hidden_size].set(folded[0][0])).astype(jnp.bfloat16)

    L = len(folded) - 1
    if L > 0:
        padded = [jnp.zeros((H_pad, H_pad), jnp.float32)
                  .at[:hidden_size, :hidden_size].set(w_f) for w_f, _ in folded[1:]]
        w_stack = jnp.stack(padded).astype(jnp.bfloat16)          # (L, H_pad, H_pad)
    else:
        w_stack = None

    shift_rows = [jnp.zeros((1, H_pad), jnp.float32).at[0, :hidden_size].set(sh)
                  for _, sh in folded]
    shifts = jnp.stack(shift_rows)                                 # (L+1, 1, H_pad) f32

    wf, bf = raw["final"]
    num_targets = int(wf.shape[1])
    T_pad = _round_up(num_targets, _LANE)
    wf_pad = (jnp.zeros((H_pad, T_pad), jnp.float32)
              .at[:hidden_size, :num_targets].set(wf)).astype(jnp.bfloat16)
    bf_pad = jnp.zeros((1, T_pad), jnp.float32).at[0, :num_targets].set(bf)

    return {"w0": w0, "w_stack": w_stack, "shifts": shifts, "wf": wf_pad, "bf": bf_pad,
            "num_targets": num_targets}


def mlp_forward(x, prepared, block_batch=1024):
    """Eval-mode MLP forward via one Pallas kernel over a batch-tiled grid."""
    B, F = x.shape
    w0, w_stack = prepared["w0"], prepared["w_stack"]
    shifts, wf, bf = prepared["shifts"], prepared["wf"], prepared["bf"]
    num_layers = 0 if w_stack is None else int(w_stack.shape[0])
    num_targets = prepared["num_targets"]
    F_pad, H_pad = w0.shape
    T_pad = wf.shape[1]

    # Batch tile: 16-row aligned (dense bf16 sublanes), as large as block_batch allows to amortize
    # the ~0.35 us per-grid-step cost and feed the MXU a full M dimension.
    b_aligned = _round_up(B, _BF16_SUBLANE)
    tb = _round_up(min(block_batch, b_aligned), _BF16_SUBLANE)
    # If the batch fits one tile but is big enough to split, force >= 2 grid steps so
    # dimension_semantics=("parallel",) can shard across v7x's two TensorCores.
    if b_aligned >= 2 * _BF16_SUBLANE and _round_up(B, tb) // tb < 2:
        tb = _round_up((b_aligned + 1) // 2, _BF16_SUBLANE)
    B_pad = _round_up(B, tb)

    x_pad = jnp.zeros((B_pad, F_pad), jnp.bfloat16).at[:B, :F].set(x.astype(jnp.bfloat16))

    params = [p for p in (w0, w_stack, shifts, wf, bf) if p is not None]

    # VMEM budget: resident params (1 buffer) + double-buffered bf16 x/out tiles + f32 intermediates,
    # with 2x headroom, kept within v7x's 64 MiB physical VMEM.
    param_bytes = sum(int(p.size) * p.dtype.itemsize for p in params)
    tile_bytes = 2 * tb * (F_pad + T_pad) * 2
    interm_bytes = 6 * tb * H_pad * 4
    vmem_limit = int(min(64 << 20, max(32 << 20, 2 * (param_bytes + tile_bytes + interm_bytes))))

    def run(single_buffer_params):
        def const_spec(shape):
            idx = lambda i, _r=len(shape): (0,) * _r
            if single_buffer_params:
                # Constant index_map -> double-buffering buys nothing; keep a single resident copy.
                return pl.BlockSpec(shape, idx, pipeline_mode=pl.Buffered(1))
            return pl.BlockSpec(shape, idx)

        in_specs = [pl.BlockSpec((tb, F_pad), lambda i: (i, 0))]
        in_specs += [const_spec(p.shape) for p in params]

        return pl.pallas_call(
            functools.partial(_mlp_kernel, num_layers),
            out_shape=jax.ShapeDtypeStruct((B_pad, T_pad), jnp.bfloat16),
            grid=(B_pad // tb,),
            in_specs=in_specs,
            out_specs=pl.BlockSpec((tb, T_pad), lambda i: (i, 0)),
            compiler_params=pltpu.CompilerParams(
                dimension_semantics=("parallel",),
                vmem_limit_bytes=vmem_limit,
            ),
        )(x_pad, *params)

    try:
        out = run(single_buffer_params=True)
    except Exception:
        # Fallback: default (double) buffering for the constant-index params.
        out = run(single_buffer_params=False)

    return out[:B, :num_targets].astype(jnp.float32)


def _reference_forward_f32(x, raw, eps=1e-5):
    """Pure-jnp f32 reference of the eval-mode forward."""
    h = x
    for w, gamma, beta, mean, var in raw["hidden"]:
        scale = gamma / jnp.sqrt(var + eps)
        shift = beta - mean * scale
        h = jnp.maximum(h @ w * scale[None, :] + shift[None, :], 0.0)
    wf, bf = raw["final"]
    return h @ wf + bf[None, :]


def _reference_forward_bf16(x, raw, eps=1e-5):
    """Pure-jnp reference emulating the kernel's numerics (bf16 weights/activations, f32 accum)."""
    h = x.astype(jnp.bfloat16)
    for w, gamma, beta, mean, var in raw["hidden"]:
        scale = gamma / jnp.sqrt(var + eps)
        shift = beta - mean * scale
        acc = jnp.dot(h, (w * scale[None, :]).astype(jnp.bfloat16),
                      preferred_element_type=jnp.float32)
        h = jnp.maximum(acc + shift[None, :], 0.0).astype(jnp.bfloat16)
    wf, bf = raw["final"]
    out = jnp.dot(h, wf.astype(jnp.bfloat16), preferred_element_type=jnp.float32) + bf[None, :]
    return out.astype(jnp.bfloat16).astype(jnp.float32)


if __name__ == "__main__":
    num_features = 32
    num_targets = 10
    num_layers = 2
    hidden_size = 32
    batch = 8

    key = jax.random.PRNGKey(0)
    key, kx = jax.random.split(key)
    x = jax.random.normal(kx, (batch, num_features), dtype=jnp.float32)

    raw = init_params(key, num_features, num_targets, num_layers, hidden_size)
    prepared = prepare_params(raw)

    out = mlp_forward(x, prepared)
    out = jax.block_until_ready(out)
    assert out.shape == (batch, num_targets)
    assert jnp.all(jnp.isfinite(out))

    ref_bf16 = _reference_forward_bf16(x, raw)   # same numerics as the kernel -> tight tolerance
    ref_f32 = _reference_forward_f32(x, raw)     # pure f32 math -> loose tolerance (bf16 cast error)
    assert jnp.allclose(out, ref_bf16, atol=3e-2, rtol=3e-2)
    assert jnp.allclose(out, ref_f32, atol=1e-1, rtol=1e-1)
    print("KERNEL_OK")
</pallas_src>

<mosaic_0001>
module attributes {stable_mosaic.version = 11 : i64} {
  func.func @_mlp_kernel(%arg0: i32, %arg1: memref<16x128xbf16, #tpu.memory_space<vmem>>, %arg2: memref<128x128xbf16, #tpu.memory_space<vmem>>, %arg3: memref<2x128x128xbf16, #tpu.memory_space<vmem>>, %arg4: memref<3x1x128xf32, #tpu.memory_space<vmem>>, %arg5: memref<128x128xbf16, #tpu.memory_space<vmem>>, %arg6: memref<1x128xf32, #tpu.memory_space<vmem>>, %arg7: memref<16x128xbf16, #tpu.memory_space<vmem>>) attributes {dimension_semantics = [#tpu.dimension_semantics<parallel>], iteration_bounds = array<i64: 1>, scalar_prefetch = 0 : i64, scratch_operands = 0 : i64, tpu.core_type = #tpu.core_type<tc>, window_params = [{transform_indices = @transform_0, window_bounds = array<i64: 16, 128>}, {pipeline_mode = #tpu.pipeline_mode<synchronous>, transform_indices = @transform_1, window_bounds = array<i64: 128, 128>}, {pipeline_mode = #tpu.pipeline_mode<synchronous>, transform_indices = @transform_2, window_bounds = array<i64: 2, 128, 128>}, {pipeline_mode = #tpu.pipeline_mode<synchronous>, transform_indices = @transform_3, window_bounds = array<i64: 3, 1, 128>}, {pipeline_mode = #tpu.pipeline_mode<synchronous>, transform_indices = @transform_4, window_bounds = array<i64: 128, 128>}, {pipeline_mode = #tpu.pipeline_mode<synchronous>, transform_indices = @transform_5, window_bounds = array<i64: 1, 128>}, {transform_indices = @transform_6, window_bounds = array<i64: 16, 128>}]} {
    %c0 = arith.constant 0 : index
    %c0_0 = arith.constant 0 : index
    %0 = vector.load %arg1[%c0, %c0_0] : memref<16x128xbf16, #tpu.memory_space<vmem>>, vector<16x128xbf16>
    %c0_1 = arith.constant 0 : index
    %c0_2 = arith.constant 0 : index
    %1 = vector.load %arg2[%c0_1, %c0_2] : memref<128x128xbf16, #tpu.memory_space<vmem>>, vector<128x128xbf16>
    %cst = arith.constant dense<0.000000e+00> : vector<16x128xf32>
    %2 = tpu.matmul %0, %1, %cst {dimension_numbers = #tpu.dot_dimension_numbers<[1], [0], [0], [1], [0, 0, 1, 1], [], []>} : vector<16x128xbf16>, vector<128x128xbf16>, vector<16x128xf32> -> vector<16x128xf32>
    %c0_3 = arith.constant 0 : index
    %c0_4 = arith.constant 0 : index
    %c0_5 = arith.constant 0 : index
    %3 = vector.load %arg4[%c0_3, %c0_4, %c0_5] : memref<3x1x128xf32, #tpu.memory_space<vmem>>, vector<1x1x128xf32>
    %4 = vector.shape_cast %3 : vector<1x1x128xf32> to vector<1x128xf32>
    %5 = vector.broadcast %4 : vector<1x128xf32> to vector<16x128xf32>
    %6 = arith.addf %2, %5 : vector<16x128xf32>
    %cst_6 = arith.constant 0.000000e+00 : f32
    %7 = vector.broadcast %cst_6 : f32 to vector<16x128xf32>
    %8 = arith.maximumf %6, %7 : vector<16x128xf32>
    %9 = arith.truncf %8 : vector<16x128xf32> to vector<16x128xbf16>
    %c0_7 = arith.constant 0 : index
    %c0_8 = arith.constant 0 : index
    %c0_9 = arith.constant 0 : index
    %10 = vector.load %arg3[%c0_7, %c0_8, %c0_9] : memref<2x128x128xbf16, #tpu.memory_space<vmem>>, vector<1x128x128xbf16>
    %11 = vector.shape_cast %10 : vector<1x128x128xbf16> to vector<128x128xbf16>
    %cst_10 = arith.constant dense<0.000000e+00> : vector<16x128xf32>
    %12 = tpu.matmul %9, %11, %cst_10 {dimension_numbers = #tpu.dot_dimension_numbers<[1], [0], [0], [1], [0, 0, 1, 1], [], []>} : vector<16x128xbf16>, vector<128x128xbf16>, vector<16x128xf32> -> vector<16x128xf32>
    %c1 = arith.constant 1 : index
    %c0_11 = arith.constant 0 : index
    %c0_12 = arith.constant 0 : index
    %13 = vector.load %arg4[%c1, %c0_11, %c0_12] : memref<3x1x128xf32, #tpu.memory_space<vmem>>, vector<1x1x128xf32>
    %14 = vector.shape_cast %13 : vector<1x1x128xf32> to vector<1x128xf32>
    %15 = vector.broadcast %14 : vector<1x128xf32> to vector<16x128xf32>
    %16 = arith.addf %12, %15 : vector<16x128xf32>
    %cst_13 = arith.constant 0.000000e+00 : f32
    %17 = vector.broadcast %cst_13 : f32 to vector<16x128xf32>
    %18 = arith.maximumf %16, %17 : vector<16x128xf32>
    %19 = arith.truncf %18 : vector<16x128xf32> to vector<16x128xbf16>
    %c1_14 = arith.constant 1 : index
    %c0_15 = arith.constant 0 : index
    %c0_16 = arith.constant 0 : index
    %20 = vector.load %arg3[%c1_14, %c0_15, %c0_16] : memref<2x128x128xbf16, #tpu.memory_space<vmem>>, vector<1x128x128xbf16>
    %21 = vector.shape_cast %20 : vector<1x128x128xbf16> to vector<128x128xbf16>
    %cst_17 = arith.constant dense<0.000000e+00> : vector<16x128xf32>
    %22 = tpu.matmul %19, %21, %cst_17 {dimension_numbers = #tpu.dot_dimension_numbers<[1], [0], [0], [1], [0, 0, 1, 1], [], []>} : vector<16x128xbf16>, vector<128x128xbf16>, vector<16x128xf32> -> vector<16x128xf32>
    %c2 = arith.constant 2 : index
    %c0_18 = arith.constant 0 : index
    %c0_19 = arith.constant 0 : index
    %23 = vector.load %arg4[%c2, %c0_18, %c0_19] : memref<3x1x128xf32, #tpu.memory_space<vmem>>, vector<1x1x128xf32>
    %24 = vector.shape_cast %23 : vector<1x1x128xf32> to vector<1x128xf32>
    %25 = vector.broadcast %24 : vector<1x128xf32> to vector<16x128xf32>
    %26 = arith.addf %22, %25 : vector<16x128xf32>
    %cst_20 = arith.constant 0.000000e+00 : f32
    %27 = vector.broadcast %cst_20 : f32 to vector<16x128xf32>
    %28 = arith.maximumf %26, %27 : vector<16x128xf32>
    %29 = arith.truncf %28 : vector<16x128xf32> to vector<16x128xbf16>
    %c0_21 = arith.constant 0 : index
    %c0_22 = arith.constant 0 : index
    %30 = vector.load %arg5[%c0_21, %c0_22] : memref<128x128xbf16, #tpu.memory_space<vmem>>, vector<128x128xbf16>
    %cst_23 = arith.constant dense<0.000000e+00> : vector<16x128xf32>
    %31 = tpu.matmul %29, %30, %cst_23 {dimension_numbers = #tpu.dot_dimension_numbers<[1], [0], [0], [1], [0, 0, 1, 1], [], []>} : vector<16x128xbf16>, vector<128x128xbf16>, vector<16x128xf32> -> vector<16x128xf32>
    %c0_24 = arith.constant 0 : index
    %c0_25 = arith.constant 0 : index
    %32 = vector.load %arg6[%c0_24, %c0_25] : memref<1x128xf32, #tpu.memory_space<vmem>>, vector<1x128xf32>
    %33 = vector.broadcast %32 : vector<1x128xf32> to vector<16x128xf32>
    %34 = arith.addf %31, %33 : vector<16x128xf32>
    %35 = arith.truncf %34 : vector<16x128xf32> to vector<16x128xbf16>
    %c0_26 = arith.constant 0 : index
    %c0_27 = arith.constant 0 : index
    %36 = vector.load %arg7[%c0_26, %c0_27] : memref<16x128xbf16, #tpu.memory_space<vmem>>, vector<16x128xbf16>
    tpu.vector_store %arg7[%c0_26, %c0_27], %35 {strides = array<i32>} : memref<16x128xbf16, #tpu.memory_space<vmem>>, vector<16x128xbf16>,
    return
  }
  func.func @transform_0(%arg0: i32) -> (i32, i32) {
    %c0_i32 = arith.constant 0 : i32
    %c0_i32_0 = arith.constant 0 : i32
    return %arg0, %c0_i32 : i32, i32
  }
  func.func @transform_1(%arg0: i32) -> (i32, i32) {
    %c0_i32 = arith.constant 0 : i32
    %c0_i32_0 = arith.constant 0 : i32
    %c0_i32_1 = arith.constant 0 : i32
    return %c0_i32, %c0_i32_0 : i32, i32
  }
  func.func @transform_2(%arg0: i32) -> (i32, i32, i32) {
    %c0_i32 = arith.constant 0 : i32
    %c0_i32_0 = arith.constant 0 : i32
    %c0_i32_1 = arith.constant 0 : i32
    %c0_i32_2 = arith.constant 0 : i32
    return %c0_i32, %c0_i32_0, %c0_i32_1 : i32, i32, i32
  }
  func.func @transform_3(%arg0: i32) -> (i32, i32, i32) {
    %c0_i32 = arith.constant 0 : i32
    %c0_i32_0 = arith.constant 0 : i32
    %c0_i32_1 = arith.constant 0 : i32
    %c0_i32_2 = arith.constant 0 : i32
    return %c0_i32, %c0_i32_0, %c0_i32_1 : i32, i32, i32
  }
  func.func @transform_4(%arg0: i32) -> (i32, i32) {
    %c0_i32 = arith.constant 0 : i32
    %c0_i32_0 = arith.constant 0 : i32
    %c0_i32_1 = arith.constant 0 : i32
    return %c0_i32, %c0_i32_0 : i32, i32
  }
  func.func @transform_5(%arg0: i32) -> (i32, i32) {
    %c0_i32 = arith.constant 0 : i32
    %c0_i32_0 = arith.constant 0 : i32
    %c0_i32_1 = arith.constant 0 : i32
    return %c0_i32, %c0_i32_0 : i32, i32
  }
  func.func @transform_6(%arg0: i32) -> (i32, i32) {
    %c0_i32 = arith.constant 0 : i32
    %c0_i32_0 = arith.constant 0 : i32
    return %arg0, %c0_i32 : i32, i32
  }
}

module attributes {stable_mosaic.version = 11 : i64} {
  func.func @_mlp_kernel(%arg0: i32, %arg1: memref<16x128xbf16, #tpu.memory_space<vmem>>, %arg2: memref<128x128xbf16, #tpu.memory_space<vmem>>, %arg3: memref<2x128x128xbf16, #tpu.memory_space<vmem>>, %arg4: memref<3x1x128xf32, #tpu.memory_space<vmem>>, %arg5: memref<128x128xbf16, #tpu.memory_space<vmem>>, %arg6: memref<1x128xf32, #tpu.memory_space<vmem>>, %arg7: memref<16x128xbf16, #tpu.memory_space<vmem>>) attributes {dimension_semantics = [#tpu.dimension_semantics<parallel>], iteration_bounds = array<i64: 1>, scalar_prefetch = 0 : i64, scratch_operands = 0 : i64, tpu.core_type = #tpu.core_type<tc>, window_params = [{transform_indices = @transform_0, window_bounds = array<i64: 16, 128>}, {pipeline_mode = #tpu.pipeline_mode<synchronous>, transform_indices = @transform_1, window_bounds = array<i64: 128, 128>}, {pipeline_mode = #tpu.pipeline_mode<synchronous>, transform_indices = @transform_2, window_bounds = array<i64: 2, 128, 128>}, {pipeline_mode = #tpu.pipeline_mode<synchronous>, transform_indices = @transform_3, window_bounds = array<i64: 3, 1, 128>}, {pipeline_mode = #tpu.pipeline_mode<synchronous>, transform_indices = @transform_4, window_bounds = array<i64: 128, 128>}, {pipeline_mode = #tpu.pipeline_mode<synchronous>, transform_indices = @transform_5, window_bounds = array<i64: 1, 128>}, {transform_indices = @transform_6, window_bounds = array<i64: 16, 128>}]} {
    %c0 = arith.constant 0 : index
    %c0_0 = arith.constant 0 : index
    %0 = vector.load %arg1[%c0, %c0_0] : memref<16x128xbf16, #tpu.memory_space<vmem>>, vector<16x128xbf16>
    %c0_1 = arith.constant 0 : index
    %c0_2 = arith.constant 0 : index
    %1 = vector.load %arg2[%c0_1, %c0_2] : memref<128x128xbf16, #tpu.memory_space<vmem>>, vector<128x128xbf16>
    %cst = arith.constant dense<0.000000e+00> : vector<16x128xf32>
    %2 = tpu.matmul %0, %1, %cst {dimension_numbers = #tpu.dot_dimension_numbers<[1], [0], [0], [1], [0, 0, 1, 1], [], []>} : vector<16x128xbf16>, vector<128x128xbf16>, vector<16x128xf32> -> vector<16x128xf32>
    %c0_3 = arith.constant 0 : index
    %c0_4 = arith.constant 0 : index
    %c0_5 = arith.constant 0 : index
    %3 = vector.load %arg4[%c0_3, %c0_4, %c0_5] : memref<3x1x128xf32, #tpu.memory_space<vmem>>, vector<1x1x128xf32>
    %4 = vector.shape_cast %3 : vector<1x1x128xf32> to vector<1x128xf32>
    %5 = vector.broadcast %4 : vector<1x128xf32> to vector<16x128xf32>
    %6 = arith.addf %2, %5 : vector<16x128xf32>
    %cst_6 = arith.constant 0.000000e+00 : f32
    %7 = vector.broadcast %cst_6 : f32 to vector<16x128xf32>
    %8 = arith.maximumf %6, %7 : vector<16x128xf32>
    %9 = arith.truncf %8 : vector<16x128xf32> to vector<16x128xbf16>
    %c0_7 = arith.constant 0 : index
    %c0_8 = arith.constant 0 : index
    %c0_9 = arith.constant 0 : index
    %10 = vector.load %arg3[%c0_7, %c0_8, %c0_9] : memref<2x128x128xbf16, #tpu.memory_space<vmem>>, vector<1x128x128xbf16>
    %11 = vector.shape_cast %10 : vector<1x128x128xbf16> to vector<128x128xbf16>
    %cst_10 = arith.constant dense<0.000000e+00> : vector<16x128xf32>
    %12 = tpu.matmul %9, %11, %cst_10 {dimension_numbers = #tpu.dot_dimension_numbers<[1], [0], [0], [1], [0, 0, 1, 1], [], []>} : vector<16x128xbf16>, vector<128x128xbf16>, vector<16x128xf32> -> vector<16x128xf32>
    %c1 = arith.constant 1 : index
    %c0_11 = arith.constant 0 : index
    %c0_12 = arith.constant 0 : index
    %13 = vector.load %arg4[%c1, %c0_11, %c0_12] : memref<3x1x128xf32, #tpu.memory_space<vmem>>, vector<1x1x128xf32>
    %14 = vector.shape_cast %13 : vector<1x1x128xf32> to vector<1x128xf32>
    %15 = vector.broadcast %14 : vector<1x128xf32> to vector<16x128xf32>
    %16 = arith.addf %12, %15 : vector<16x128xf32>
    %cst_13 = arith.constant 0.000000e+00 : f32
    %17 = vector.broadcast %cst_13 : f32 to vector<16x128xf32>
    %18 = arith.maximumf %16, %17 : vector<16x128xf32>
    %19 = arith.truncf %18 : vector<16x128xf32> to vector<16x128xbf16>
    %c1_14 = arith.constant 1 : index
    %c0_15 = arith.constant 0 : index
    %c0_16 = arith.constant 0 : index
    %20 = vector.load %arg3[%c1_14, %c0_15, %c0_16] : memref<2x128x128xbf16, #tpu.memory_space<vmem>>, vector<1x128x128xbf16>
    %21 = vector.shape_cast %20 : vector<1x128x128xbf16> to vector<128x128xbf16>
    %cst_17 = arith.constant dense<0.000000e+00> : vector<16x128xf32>
    %22 = tpu.matmul %19, %21, %cst_17 {dimension_numbers = #tpu.dot_dimension_numbers<[1], [0], [0], [1], [0, 0, 1, 1], [], []>} : vector<16x128xbf16>, vector<128x128xbf16>, vector<16x128xf32> -> vector<16x128xf32>
    %c2 = arith.constant 2 : index
    %c0_18 = arith.constant 0 : index
    %c0_19 = arith.constant 0 : index
    %23 = vector.load %arg4[%c2, %c0_18, %c0_19] : memref<3x1x128xf32, #tpu.memory_space<vmem>>, vector<1x1x128xf32>
    %24 = vector.shape_cast %23 : vector<1x1x128xf32> to vector<1x128xf32>
    %25 = vector.broadcast %24 : vector<1x128xf32> to vector<16x128xf32>
    %26 = arith.addf %22, %25 : vector<16x128xf32>
    %cst_20 = arith.constant 0.000000e+00 : f32
    %27 = vector.broadcast %cst_20 : f32 to vector<16x128xf32>
    %28 = arith.maximumf %26, %27 : vector<16x128xf32>
    %29 = arith.truncf %28 : vector<16x128xf32> to vector<16x128xbf16>
    %c0_21 = arith.constant 0 : index
    %c0_22 = arith.constant 0 : index
    %30 = vector.load %arg5[%c0_21, %c0_22] : memref<128x128xbf16, #tpu.memory_space<vmem>>, vector<128x128xbf16>
    %cst_23 = arith.constant dense<0.000000e+00> : vector<16x128xf32>
    %31 = tpu.matmul %29, %30, %cst_23 {dimension_numbers = #tpu.dot_dimension_numbers<[1], [0], [0], [1], [0, 0, 1, 1], [], []>} : vector<16x128xbf16>, vector<128x128xbf16>, vector<16x128xf32> -> vector<16x128xf32>
    %c0_24 = arith.constant 0 : index
    %c0_25 = arith.constant 0 : index
    %32 = vector.load %arg6[%c0_24, %c0_25] : memref<1x128xf32, #tpu.memory_space<vmem>>, vector<1x128xf32>
    %33 = vector.broadcast %32 : vector<1x128xf32> to vector<16x128xf32>
    %34 = arith.addf %31, %33 : vector<16x128xf32>
    %35 = arith.truncf %34 : vector<16x128xf32> to vector<16x128xbf16>
    %c0_26 = arith.constant 0 : index
    %c0_27 = arith.constant 0 : index
    %36 = vector.load %arg7[%c0_26, %c0_27] : memref<16x128xbf16, #tpu.memory_space<vmem>>, vector<16x128xbf16>
    tpu.vector_store %arg7[%c0_26, %c0_27], %35 {strides = array<i32>} : memref<16x128xbf16, #tpu.memory_space<vmem>>, vector<16x128xbf16>,
    return
  }
  func.func @transform_0(%arg0: i32) -> (i32, i32) {
    %c0_i32 = arith.constant 0 : i32
    %c0_i32_0 = arith.constant 0 : i32
    return %arg0, %c0_i32 : i32, i32
  }
  func.func @transform_1(%arg0: i32) -> (i32, i32) {
    %c0_i32 = arith.constant 0 : i32
    %c0_i32_0 = arith.constant 0 : i32
    %c0_i32_1 = arith.constant 0 : i32
    return %c0_i32, %c0_i32_0 : i32, i32
  }
  func.func @transform_2(%arg0: i32) -> (i32, i32, i32) {
    %c0_i32 = arith.constant 0 : i32
    %c0_i32_0 = arith.constant 0 : i32
    %c0_i32_1 = arith.constant 0 : i32
    %c0_i32_2 = arith.constant 0 : i32
    return %c0_i32, %c0_i32_0, %c0_i32_1 : i32, i32, i32
  }
  func.func @transform_3(%arg0: i32) -> (i32, i32, i32) {
    %c0_i32 = arith.constant 0 : i32
    %c0_i32_0 = arith.constant 0 : i32
    %c0_i32_1 = arith.constant 0 : i32
    %c0_i32_2 = arith.constant 0 : i32
    return %c0_i32, %c0_i32_0, %c0_i32_1 : i32, i32, i32
  }
  func.func @transform_4(%arg0: i32) -> (i32, i32) {
    %c0_i32 = arith.constant 0 : i32
    %c0_i32_0 = arith.constant 0 : i32
    %c0_i32_1 = arith.constant 0 : i32
    return %c0_i32, %c0_i32_0 : i32, i32
  }
  func.func @transform_5(%arg0: i32) -> (i32, i32) {
    %c0_i32 = arith.constant 0 : i32
    %c0_i32_0 = arith.constant 0 : i32
    %c0_i32_1 = arith.constant 0 : i32
    return %c0_i32, %c0_i32_0 : i32, i32
  }
  func.func @transform_6(%arg0: i32) -> (i32, i32) {
    %c0_i32 = arith.constant 0 : i32
    %c0_i32_0 = arith.constant 0 : i32
    return %arg0, %c0_i32 : i32, i32
  }
}

</mosaic_0001>

<bundles_post_ra>
// kernel: tpu_custom_call.1
= control target key start
LH: loop header
LB: loop body
LE: loop exit
PB: predicated region body
PF: predicated region fallthrough
CT: control target
= control target key end

     0   :  { %11 = vsyncpa [#allocation3], 0  ;;  %s1086_s0 = inlined_call_operand.hbm [shape: bf16[16,128], index: 0, kind: input, shape index: {}]   ;;  %s1087_s1 = inlined_call_operand.hbm [shape: bf16[128,128], index: 1, kind: input, shape index: {}]   ;;  %s1088_s2 = inlined_call_operand.hbm [shape: bf16[2,128,128], index: 2, kind: input, shape index: {}]   ;;  %s1089_s3 = inlined_call_operand.vmem [shape: f32[3,1,128], index: 3, kind: input, shape index: {}]   ;;  %s1090_s4 = inlined_call_operand.hbm [shape: bf16[128,128], index: 4, kind: input, shape index: {}]   ;;  %s1091_s5 = inlined_call_operand.vmem [shape: f32[1,128], index: 5, kind: input, shape index: {}]   ;;  %s1092_s6 = inlined_call_operand.hbm [shape: bf16[16,128], index: 6, kind: output, shape index: {}]  }
   0x1   :  { %12 = vsyncpa [#allocation6], 0 }
   0x2   :  { %13 = vsyncpa [#allocation9], 0 }
   0x3   :  { %14 = vsyncpa [#allocation4], 0  ;;  %s901_s21 = smov [#allocation5]   ;;  %s902_s23 = smov [#allocation2]  }
   0x4   :  { %s32_s22 = sshll.u32 %s901_s21, 4  ;;  %s20_s24 = sshll.u32 %s902_s23, 4  ;;  %s33_s22 = int_to_ptr.vmem [resolvable:$true] %s32_s22  ;;  %s945_s24 = int_to_ptr.vmem [resolvable:$true] %s20_s24 }
   0x5   :  { %s783_s27 = scalar_lea.hbm %s1087_s1, 1024 }
   0x6   :  { %p784_p0 = scmp.ne.s32.totalorder %s1087_s1, %s783_s27  ;;  %p787_p1 = scmp.lt.u32.totalorder %s783_s27, %s1087_s1 }
   0x8   :  { %p789_p2 = pnand %p787_p1, %p784_p0 }
   0xa   :  { %792 = shalt.err (!%p789_p2)
}
   0xb   :  { %s793_s8 = scalar_lea.vmem %s33_s22, 1024  ;;  %p798_p4 = scmp.lt.s32.totalorder %s33_s22, %s33_s22 }
   0xc   :  { %p794_p3 = scmp.ne.s32.totalorder %s33_s22, %s793_s8  ;;  %p799_p5 = scmp.lt.s32.totalorder %s793_s8, %s793_s8 }
   0xe   :  { %p800_p6 = por %p799_p5, %p798_p4 }
  0x10   :  { %p801_p7 = pnand %p800_p6, %p794_p3 }
  0x12   :  { %804 = shalt.err (!%p801_p7)
}
  0x13   :  { %s903_s9 = smov 64   ;;  %s904_s10 = smov 4  }
  0x14   :  { %38 = dma.hbm_to_vmem [thread:$0]  %s1087_s1, 1024, %s33_s22, [#allocation6], %s903_s9, %s903_s9, %s904_s10  }
  0x15   :  { %s805_s15 = scalar_lea.hbm %s1086_s0, 128 }
  0x16   :  { %p806_p8 = scmp.ne.s32.totalorder %s1086_s0, %s805_s15  ;;  %p809_p9 = scmp.lt.u32.totalorder %s805_s15, %s1086_s0 }
  0x18   :  { %p811_p10 = pnand %p809_p9, %p806_p8 }
  0x1a   :  { %814 = shalt.err (!%p811_p10)
}
  0x1b   :  { %s815_s20 = scalar_lea.vmem %s945_s24, 128  ;;  %p820_p12 = scmp.lt.s32.totalorder %s945_s24, %s945_s24 }
  0x1c   :  { %p816_p11 = scmp.ne.s32.totalorder %s945_s24, %s815_s20  ;;  %p821_p13 = scmp.lt.s32.totalorder %s815_s20, %s815_s20 }
  0x1e   :  { %p822_p0 = por %p821_p13, %p820_p12 }
  0x20   :  { %p823_p1 = pnand %p822_p0, %p816_p11 }
  0x22   :  { %826 = shalt.err (!%p823_p1)
}
  0x23   :  { %26 = dma.hbm_to_vmem [thread:$0]  %s1086_s0, 128, %s945_s24, [#allocation3], %s903_s9, %s903_s9, %s904_s10  }
  0x24   :  { %s905_s22 = smov [#allocation7]   ;;  %s906_s25 = smov [#allocation8]  }
  0x25   :  { %s44_s23 = sshll.u32 %s905_s22, 4  ;;  %s58_s26 = sshll.u32 %s906_s25, 4  ;;  %s45_s23 = int_to_ptr.vmem [resolvable:$true] %s44_s23  ;;  %s982_s26 = int_to_ptr.vmem [resolvable:$true] %s58_s26 }
  0x26   :  { %s827_s29 = scalar_lea.hbm %s1088_s2, 2048 }
  0x27   :  { %p828_p2 = scmp.ne.s32.totalorder %s1088_s2, %s827_s29  ;;  %p831_p3 = scmp.lt.u32.totalorder %s827_s29, %s1088_s2 }
  0x29   :  { %p833_p4 = pnand %p831_p3, %p828_p2 }
  0x2b   :  { %836 = shalt.err (!%p833_p4)
}
  0x2c   :  { %s837_s0 = scalar_lea.vmem %s45_s23, 2048  ;;  %p842_p6 = scmp.lt.s32.totalorder %s45_s23, %s45_s23 }
  0x2d   :  { %p838_p5 = scmp.ne.s32.totalorder %s45_s23, %s837_s0  ;;  %p843_p7 = scmp.lt.s32.totalorder %s837_s0, %s837_s0 }
  0x2f   :  { %p844_p8 = por %p843_p7, %p842_p6 }
  0x31   :  { %p845_p9 = pnand %p844_p8, %p838_p5 }
  0x33   :  { %848 = shalt.err (!%p845_p9)
}
  0x34   :  { %50 = dma.hbm_to_vmem [thread:$0]  %s1088_s2, 2048, %s45_s23, [#allocation6], %s903_s9, %s903_s9, %s904_s10  }
  0x35   :  { %s849_s15 = scalar_lea.hbm %s1090_s4, 1024 }
  0x36   :  { %p850_p10 = scmp.ne.s32.totalorder %s1090_s4, %s849_s15  ;;  %p853_p11 = scmp.lt.u32.totalorder %s849_s15, %s1090_s4 }
  0x38   :  { %p855_p12 = pnand %p853_p11, %p850_p10 }
  0x3a   :  { %858 = shalt.err (!%p855_p12)
}
  0x3b   :  { %s859_s20 = scalar_lea.vmem %s982_s26, 1024  ;;  %p864_p0 = scmp.lt.s32.totalorder %s982_s26, %s982_s26 }
  0x3c   :  { %p860_p13 = scmp.ne.s32.totalorder %s982_s26, %s859_s20  ;;  %p865_p1 = scmp.lt.s32.totalorder %s859_s20, %s859_s20 }
  0x3e   :  { %p866_p2 = por %p865_p1, %p864_p0 }
  0x40   :  { %p867_p3 = pnand %p866_p2, %p860_p13 }
  0x42   :  { %870 = shalt.err (!%p867_p3)
}
  0x43   :  { %64 = dma.hbm_to_vmem [thread:$0]  %s1090_s4, 1024, %s982_s26, [#allocation9], %s903_s9, %s903_s9, %s904_s10  }
  0x44   :  { %893 = dma.done.wait [#allocation3], 128  }
  0x45   :  { %894 = vsyncadd [#allocation3], 4294967168 }
  0x46   :  { %895 = dma.done.wait [#allocation6], 3072  }
  0x47   :  { %896 = vsyncadd [#allocation6], 4294964224 }
  0x48   :  { %897 = dma.done.wait [#allocation9], 1024  }
  0x49   :  { %898 = vsyncadd [#allocation9], 4294966272  ;;  %v907_v0 = vmov 0.0   ;;  %vm908_vm0 = vmmov 0   ;;  %v750_v1 = vld [vmem:[#allocation5] sm:$0xff]   ;;  %v751_v2 = vld [vmem:[#allocation5 + $0x8] sm:$0xff]  }
  0x4a   :  { %661 = vmatprep.subr.bf16.mxu0 %v907_v0  ;;  %677 = vmatprep.mubr.msk.bf16.mxu0 %vm908_vm0, %v907_v0  ;;  %v752_v3 = vld [vmem:[#allocation5 + $0x10] sm:$0xff]   ;;  %v759_v4 = vld [vmem:[#allocation7] sm:$0xff]   ;;  %v753_v5 = vld [vmem:[#allocation5 + $0x18] sm:$0xff]   ;;  %s909_s29 = smov [#allocation10]  }
  0x4b   :  { %681 = vmatprep.subr.bf16.mxu1 %v907_v0  ;;  %697 = vmatprep.mubr.msk.bf16.mxu1 %vm908_vm0, %v907_v0  ;;  %v760_v6 = vld [vmem:[#allocation7 + $0x8] sm:$0xff]   ;;  %v754_v7 = vld [vmem:[#allocation5 + $0x20] sm:$0xff]   ;;  %v761_v8 = vld [vmem:[#allocation7 + $0x10] sm:$0xff]   ;;  %s563_s30 = sshll.u32 %s909_s29, 4  ;;  %s564_s30 = int_to_ptr.vmem [resolvable:$true] %s563_s30 }
  0x4c   :  { %662 = vmatpush3.bf16.msra.mxu0 %v750_v1  ;;  %682 = vmatpush3.bf16.msra.mxu1 %v759_v4  ;;  %v755_v9 = vld [vmem:[#allocation5 + $0x28] sm:$0xff]   ;;  %v762_v10 = vld [vmem:[#allocation7 + $0x18] sm:$0xff]   ;;  %v756_v11 = vld [vmem:[#allocation5 + $0x30] sm:$0xff]   ;;  %p876_p5 = scmp.lt.s32.totalorder %s564_s30, %s564_s30 }
  0x4d   :  { %663 = vmatprep.subr.bf16.mxu0 %v907_v0  ;;  %683 = vmatprep.subr.bf16.mxu1 %v907_v0  ;;  %v763_v12 = vld [vmem:[#allocation7 + $0x20] sm:$0xff]   ;;  %v757_v13 = vld [vmem:[#allocation5 + $0x38] sm:$0xff]   ;;  %v764_v14 = vld [vmem:[#allocation7 + $0x28] sm:$0xff]  }
  0x4e   :  { %v758_v15 = vld [vmem:[#allocation2] sm:$0xff]   ;;  %v765_v16 = vld [vmem:[#allocation7 + $0x30] sm:$0xff]   ;;  %v767_v18 = vld [vmem:[#allocation7 + $0x40] sm:$0xff]  }
  0x4f   :  { %v766_v17 = vld [vmem:[#allocation7 + $0x38] sm:$0xff]   ;;  %v768_v19 = vld [vmem:[#allocation7 + $0x48] sm:$0xff]   ;;  %v769_v20 = vld [vmem:[#allocation7 + $0x50] sm:$0xff]  }
  0x50   :  { %664 = vmatpush3.bf16.msra.mxu0 %v751_v2  ;;  %684 = vmatpush3.bf16.msra.mxu1 %v760_v6  ;;  %v770_v21 = vld [vmem:[#allocation7 + $0x58] sm:$0xff]   ;;  %v771_v22 = vld [vmem:[#allocation7 + $0x60] sm:$0xff]   ;;  %v772_v23 = vld [vmem:[#allocation7 + $0x68] sm:$0xff]  }
  0x51   :  { %665 = vmatprep.subr.bf16.mxu0 %v907_v0  ;;  %685 = vmatprep.subr.bf16.mxu1 %v907_v0  ;;  %v577_v24 = vld [vmem:[%s1089_s3] ss:$0 sm:$0xff]  ;;  %v773_v34 = vld [vmem:[#allocation7 + $0x70] sm:$0xff]   ;;  %v775_v36 = vld [vmem:[#allocation8] sm:$0xff]  }
  0x52   :  { %v774_v35 = vld [vmem:[#allocation7 + $0x78] sm:$0xff]   ;;  %v776_v37 = vld [vmem:[#allocation8 + $0x8] sm:$0xff]   ;;  %v777_v38 = vld [vmem:[#allocation8 + $0x10] sm:$0xff]  }
  0x53   :  { %v778_v39 = vld [vmem:[#allocation8 + $0x18] sm:$0xff]   ;;  %v779_v40 = vld [vmem:[#allocation8 + $0x20] sm:$0xff]   ;;  %v780_v41 = vld [vmem:[#allocation8 + $0x28] sm:$0xff]  }
  0x54   :  { %666 = vmatpush3.bf16.msra.mxu0 %v752_v3  ;;  %686 = vmatpush3.bf16.msra.mxu1 %v761_v8  ;;  %v588_v42 = vld [vmem:[%s1089_s3 + $0x1] ss:$0 sm:$0xff]  ;;  %v781_v52 = vld [vmem:[#allocation8 + $0x30] sm:$0xff]   ;;  %v598_v54 = vld [vmem:[%s1089_s3 + $0x2] ss:$0 sm:$0xff]  ;;  %s871_s3 = scalar_lea.vmem %s564_s30, 128 }
  0x55   :  { %667 = vmatprep.subr.bf16.mxu0 %v907_v0  ;;  %687 = vmatprep.subr.bf16.mxu1 %v907_v0  ;;  %v782_v53 = vld [vmem:[#allocation8 + $0x38] sm:$0xff]   ;;  %p872_p4 = scmp.ne.s32.totalorder %s564_s30, %s871_s3  ;;  %p877_p6 = scmp.lt.s32.totalorder %s871_s3, %s871_s3 }
  0x57   :  { %p878_p7 = por %p877_p6, %p876_p5 }
  0x58   :  { %668 = vmatpush3.bf16.msra.mxu0 %v753_v5  ;;  %688 = vmatpush3.bf16.msra.mxu1 %v762_v10 }
  0x59   :  { %669 = vmatprep.subr.bf16.mxu0 %v907_v0  ;;  %689 = vmatprep.subr.bf16.mxu1 %v907_v0  ;;  %p879_p8 = pnand %p878_p7, %p872_p4 }
  0x5c   :  { %670 = vmatpush3.bf16.msra.mxu0 %v754_v7  ;;  %690 = vmatpush3.bf16.msra.mxu1 %v763_v12 }
  0x5d   :  { %671 = vmatprep.subr.bf16.mxu0 %v907_v0  ;;  %691 = vmatprep.subr.bf16.mxu1 %v907_v0 }
  0x60   :  { %672 = vmatpush3.bf16.msra.mxu0 %v755_v9  ;;  %692 = vmatpush3.bf16.msra.mxu1 %v764_v14 }
  0x61   :  { %673 = vmatprep.subr.bf16.mxu0 %v907_v0  ;;  %693 = vmatprep.subr.bf16.mxu1 %v907_v0 }
  0x64   :  { %674 = vmatpush3.bf16.msra.mxu0 %v756_v11  ;;  %694 = vmatpush3.bf16.msra.mxu1 %v765_v16 }
  0x65   :  { %675 = vmatprep.subr.bf16.mxu0 %v907_v0  ;;  %695 = vmatprep.subr.bf16.mxu1 %v907_v0 }
  0x68   :  { %676 = vmatpush3.bf16.msra.mxu0 %v757_v13  ;;  %696 = vmatpush3.bf16.msra.mxu1 %v766_v17 }
  0x69   :  { %701 = vmatprep.subr.bf16.mxu0 %v907_v0  ;;  %721 = vmatprep.subr.bf16.mxu1 %v907_v0 }
  0x6b   :  { %678 = vmatmul.mubr.bf16.vlgmr.msra.gmra.mrb[0].mxu0 %v758_v15 }
  0x6c   :  { %717 = vmatprep.mubr.msk.bf16.mxu0 %vm908_vm0, %v907_v0  ;;  %702 = vmatpush3.bf16.msra.mxu0 %v767_v18 }
  0x6d   :  { %703 = vmatprep.subr.bf16.mxu0 %v907_v0 }
  0x70   :  { %704 = vmatpush3.bf16.msra.mxu0 %v768_v19 }
  0x71   :  { %705 = vmatprep.subr.bf16.mxu0 %v907_v0 }
  0x74   :  { %706 = vmatpush3.bf16.msra.mxu0 %v769_v20 }
  0x75   :  { %707 = vmatprep.subr.bf16.mxu0 %v907_v0 }
  0x78   :  { %708 = vmatpush3.bf16.msra.mxu0 %v770_v21 }
  0x79   :  { %709 = vmatprep.subr.bf16.mxu0 %v907_v0 }
  0x7c   :  { %710 = vmatpush3.bf16.msra.mxu0 %v771_v22 }
  0x7d   :  { %711 = vmatprep.subr.bf16.mxu0 %v907_v0 }
  0x80   :  { %712 = vmatpush3.bf16.msra.mxu0 %v772_v23 }
  0x81   :  { %713 = vmatprep.subr.bf16.mxu0 %v907_v0 }
  0x84   :  { %714 = vmatpush3.bf16.msra.mxu0 %v773_v34 }
  0x85   :  { %715 = vmatprep.subr.bf16.mxu0 %v907_v0 }
  0x88   :  { %716 = vmatpush3.bf16.msra.mxu0 %v774_v35 }
 0x13e   :  { %v193_v25 = vpop.f32.mrb[0].mxu0 }
 0x13f   :  { %v194_v26 = vadd.f32 %v577_v24, %v193_v25  ;;  %v679_v27 = vpop.f32.mrb[1].mxu0 }
 0x140   :  { %v196_v28 = vpop.f32.mrb[2].mxu0 }
 0x141   :  { %v197_v29 = vadd.f32 %v577_v24, %v196_v28  ;;  %v680_v30 = vpop.f32.mrb[3].mxu0  ;;  %v200_v31 = vmax.f32 %v194_v26, 0.0 }
 0x143   :  { %v201_v32 = vmax.f32 %v197_v29, 0.0 }
 0x145   :  { %v202_v33 = vpack.c.bf16 %v201_v32, %v200_v31 }
 0x147   :  { %698 = vmatmul.mubr.bf16.vlgmr.msra.gmra.mrb[0].mxu1 %v202_v33 }
 0x148   :  { %737 = vmatprep.mubr.msk.bf16.mxu1 %vm908_vm0, %v907_v0  ;;  %722 = vmatpush3.bf16.msra.mxu1 %v775_v36 }
 0x149   :  { %723 = vmatprep.subr.bf16.mxu1 %v907_v0 }
 0x14c   :  { %724 = vmatpush3.bf16.msra.mxu1 %v776_v37 }
 0x14d   :  { %725 = vmatprep.subr.bf16.mxu1 %v907_v0 }
 0x150   :  { %726 = vmatpush3.bf16.msra.mxu1 %v777_v38 }
 0x151   :  { %727 = vmatprep.subr.bf16.mxu1 %v907_v0 }
 0x154   :  { %728 = vmatpush3.bf16.msra.mxu1 %v778_v39 }
 0x155   :  { %729 = vmatprep.subr.bf16.mxu1 %v907_v0 }
 0x158   :  { %730 = vmatpush3.bf16.msra.mxu1 %v779_v40 }
 0x159   :  { %731 = vmatprep.subr.bf16.mxu1 %v907_v0 }
 0x15c   :  { %732 = vmatpush3.bf16.msra.mxu1 %v780_v41 }
 0x15d   :  { %733 = vmatprep.subr.bf16.mxu1 %v907_v0 }
 0x160   :  { %734 = vmatpush3.bf16.msra.mxu1 %v781_v52 }
 0x161   :  { %735 = vmatprep.subr.bf16.mxu1 %v907_v0  ;;  %v607_v0 = vld [vmem:[%s1091_s5] ss:$0 sm:$0xff] }
 0x164   :  { %736 = vmatpush3.bf16.msra.mxu1 %v782_v53 }
 0x21a   :  { %v309_v43 = vpop.f32.mrb[0].mxu1 }
 0x21b   :  { %v310_v44 = vadd.f32 %v588_v42, %v309_v43  ;;  %v699_v45 = vpop.f32.mrb[1].mxu1 }
 0x21c   :  { %v312_v46 = vpop.f32.mrb[2].mxu1 }
 0x21d   :  { %v313_v47 = vadd.f32 %v588_v42, %v312_v46  ;;  %v700_v48 = vpop.f32.mrb[3].mxu1  ;;  %v316_v49 = vmax.f32 %v310_v44, 0.0 }
 0x21f   :  { %v317_v50 = vmax.f32 %v313_v47, 0.0 }
 0x221   :  { %v318_v51 = vpack.c.bf16 %v317_v50, %v316_v49 }
 0x223   :  { %718 = vmatmul.mubr.bf16.vlgmr.msra.gmra.mrb[4].mxu0 %v318_v51 }
 0x2f6   :  { %v426_v55 = vpop.f32.mrb[4].mxu0 }
 0x2f7   :  { %v427_v56 = vadd.f32 %v598_v54, %v426_v55  ;;  %v719_v57 = vpop.f32.mrb[5].mxu0 }
 0x2f8   :  { %v429_v58 = vpop.f32.mrb[6].mxu0 }
 0x2f9   :  { %v430_v59 = vadd.f32 %v598_v54, %v429_v58  ;;  %v720_v60 = vpop.f32.mrb[7].mxu0  ;;  %v433_v61 = vmax.f32 %v427_v56, 0.0 }
 0x2fb   :  { %v434_v62 = vmax.f32 %v430_v59, 0.0 }
 0x2fd   :  { %v435_v63 = vpack.c.bf16 %v434_v62, %v433_v61 }
 0x2ff   :  { %738 = vmatmul.mubr.bf16.vlgmr.msra.gmra.mrb[4].mxu1 %v435_v63 }
 0x3d2   :  { %v541_v1 = vpop.f32.mrb[4].mxu1 }
 0x3d3   :  { %v739_v2 = vpop.f32.mrb[5].mxu1  ;;  %v542_v4 = vadd.f32 %v607_v0, %v541_v1 }
 0x3d4   :  { %v544_v3 = vpop.f32.mrb[6].mxu1 }
 0x3d5   :  { %v545_v5 = vadd.f32 %v607_v0, %v544_v3  ;;  %v740_v6 = vpop.f32.mrb[7].mxu1 }
 0x3d7   :  { %v623_v7 = vpack.c.bf16 %v545_v5, %v542_v4 }
 0x3d9   :  { %624 = vst [vmem:[#allocation10] sm:$0xff] %v623_v7  }
 0x3da   :  { %882 = shalt.err (!%p879_p8)
}
 0x3db   :  { %s883_s8 = scalar_lea.hbm %s1092_s6, 128 }
 0x3dc   :  { %p884_p9 = scmp.ne.s32.totalorder %s1092_s6, %s883_s8  ;;  %p887_p10 = scmp.lt.u32.totalorder %s883_s8, %s1092_s6 }
 0x3de   :  { %p889_p11 = pnand %p887_p10, %p884_p9 }
 0x3e0   :  { %892 = shalt.err (!%p889_p11)
}
 0x3e1   :  { %569 = dma.vmem_to_hbm [thread:$0]  %s564_s30, 128, %s1092_s6, [#allocation4], %s903_s9, %s903_s9, %s904_s10  }
 0x3e2   :  { %899 = dma.done.wait [#allocation4], 128  }
 0x3e3   :  { %900 = vsyncadd [#allocation4], 4294967168 }
 0x3e4   :  { %573 = vsyncpa [#allocation3], 1 }
 0x3e5   :  { %574 = vsyncpa [#allocation6], 1 }
 0x3e6   :  { %575 = vsyncpa [#allocation9], 1 }
 0x3e7   :  { %576 = vsyncpa [#allocation4], 1 }

// kernel: tpu_custom_call.1
= control target key start
LH: loop header
LB: loop body
LE: loop exit
PB: predicated region body
PF: predicated region fallthrough
CT: control target
= control target key end

     0   :  { %11 = vsyncpa [#allocation3], 0  ;;  %s1086_s0 = inlined_call_operand.hbm [shape: bf16[16,128], index: 0, kind: input, shape index: {}]   ;;  %s1087_s1 = inlined_call_operand.hbm [shape: bf16[128,128], index: 1, kind: input, shape index: {}]   ;;  %s1088_s2 = inlined_call_operand.hbm [shape: bf16[2,128,128], index: 2, kind: input, shape index: {}]   ;;  %s1089_s3 = inlined_call_operand.vmem [shape: f32[3,1,128], index: 3, kind: input, shape index: {}]   ;;  %s1090_s4 = inlined_call_operand.hbm [shape: bf16[128,128], index: 4, kind: input, shape index: {}]   ;;  %s1091_s5 = inlined_call_operand.vmem [shape: f32[1,128], index: 5, kind: input, shape index: {}]   ;;  %s1092_s6 = inlined_call_operand.hbm [shape: bf16[16,128], index: 6, kind: output, shape index: {}]  }
   0x1   :  { %12 = vsyncpa [#allocation6], 0 }
   0x2   :  { %13 = vsyncpa [#allocation9], 0 }
   0x3   :  { %14 = vsyncpa [#allocation4], 0  ;;  %s901_s21 = smov [#allocation5]   ;;  %s902_s23 = smov [#allocation2]  }
   0x4   :  { %s32_s22 = sshll.u32 %s901_s21, 4  ;;  %s20_s24 = sshll.u32 %s902_s23, 4  ;;  %s33_s22 = int_to_ptr.vmem [resolvable:$true] %s32_s22  ;;  %s945_s24 = int_to_ptr.vmem [resolvable:$true] %s20_s24 }
   0x5   :  { %s783_s27 = scalar_lea.hbm %s1087_s1, 1024 }
   0x6   :  { %p784_p0 = scmp.ne.s32.totalorder %s1087_s1, %s783_s27  ;;  %p787_p1 = scmp.lt.u32.totalorder %s783_s27, %s1087_s1 }
   0x8   :  { %p789_p2 = pnand %p787_p1, %p784_p0 }
   0xa   :  { %792 = shalt.err (!%p789_p2)
}
   0xb   :  { %s793_s8 = scalar_lea.vmem %s33_s22, 1024  ;;  %p798_p4 = scmp.lt.s32.totalorder %s33_s22, %s33_s22 }
   0xc   :  { %p794_p3 = scmp.ne.s32.totalorder %s33_s22, %s793_s8  ;;  %p799_p5 = scmp.lt.s32.totalorder %s793_s8, %s793_s8 }
   0xe   :  { %p800_p6 = por %p799_p5, %p798_p4 }
  0x10   :  { %p801_p7 = pnand %p800_p6, %p794_p3 }
  0x12   :  { %804 = shalt.err (!%p801_p7)
}
  0x13   :  { %s903_s9 = smov 64   ;;  %s904_s10 = smov 4  }
  0x14   :  { %38 = dma.hbm_to_vmem [thread:$0]  %s1087_s1, 1024, %s33_s22, [#allocation6], %s903_s9, %s903_s9, %s904_s10  }
  0x15   :  { %s805_s15 = scalar_lea.hbm %s1086_s0, 128 }
  0x16   :  { %p806_p8 = scmp.ne.s32.totalorder %s1086_s0, %s805_s15  ;;  %p809_p9 = scmp.lt.u32.totalorder %s805_s15, %s1086_s0 }
  0x18   :  { %p811_p10 = pnand %p809_p9, %p806_p8 }
  0x1a   :  { %814 = shalt.err (!%p811_p10)
}
  0x1b   :  { %s815_s20 = scalar_lea.vmem %s945_s24, 128  ;;  %p820_p12 = scmp.lt.s32.totalorder %s945_s24, %s945_s24 }
  0x1c   :  { %p816_p11 = scmp.ne.s32.totalorder %s945_s24, %s815_s20  ;;  %p821_p13 = scmp.lt.s32.totalorder %s815_s20, %s815_s20 }
  0x1e   :  { %p822_p0 = por %p821_p13, %p820_p12 }
  0x20   :  { %p823_p1 = pnand %p822_p0, %p816_p11 }
  0x22   :  { %826 = shalt.err (!%p823_p1)
}
  0x23   :  { %26 = dma.hbm_to_vmem [thread:$0]  %s1086_s0, 128, %s945_s24, [#allocation3], %s903_s9, %s903_s9, %s904_s10  }
  0x24   :  { %s905_s22 = smov [#allocation7]   ;;  %s906_s25 = smov [#allocation8]  }
  0x25   :  { %s44_s23 = sshll.u32 %s905_s22, 4  ;;  %s58_s26 = sshll.u32 %s906_s25, 4  ;;  %s45_s23 = int_to_ptr.vmem [resolvable:$true] %s44_s23  ;;  %s982_s26 = int_to_ptr.vmem [resolvable:$true] %s58_s26 }
  0x26   :  { %s827_s29 = scalar_lea.hbm %s1088_s2, 2048 }
  0x27   :  { %p828_p2 = scmp.ne.s32.totalorder %s1088_s2, %s827_s29  ;;  %p831_p3 = scmp.lt.u32.totalorder %s827_s29, %s1088_s2 }
  0x29   :  { %p833_p4 = pnand %p831_p3, %p828_p2 }
  0x2b   :  { %836 = shalt.err (!%p833_p4)
}
  0x2c   :  { %s837_s0 = scalar_lea.vmem %s45_s23, 2048  ;;  %p842_p6 = scmp.lt.s32.totalorder %s45_s23, %s45_s23 }
  0x2d   :  { %p838_p5 = scmp.ne.s32.totalorder %s45_s23, %s837_s0  ;;  %p843_p7 = scmp.lt.s32.totalorder %s837_s0, %s837_s0 }
  0x2f   :  { %p844_p8 = por %p843_p7, %p842_p6 }
  0x31   :  { %p845_p9 = pnand %p844_p8, %p838_p5 }
  0x33   :  { %848 = shalt.err (!%p845_p9)
}
  0x34   :  { %50 = dma.hbm_to_vmem [thread:$0]  %s1088_s2, 2048, %s45_s23, [#allocation6], %s903_s9, %s903_s9, %s904_s10  }
  0x35   :  { %s849_s15 = scalar_lea.hbm %s1090_s4, 1024 }
  0x36   :  { %p850_p10 = scmp.ne.s32.totalorder %s1090_s4, %s849_s15  ;;  %p853_p11 = scmp.lt.u32.totalorder %s849_s15, %s1090_s4 }
  0x38   :  { %p855_p12 = pnand %p853_p11, %p850_p10 }
  0x3a   :  { %858 = shalt.err (!%p855_p12)
}
  0x3b   :  { %s859_s20 = scalar_lea.vmem %s982_s26, 1024  ;;  %p864_p0 = scmp.lt.s32.totalorder %s982_s26, %s982_s26 }
  0x3c   :  { %p860_p13 = scmp.ne.s32.totalorder %s982_s26, %s859_s20  ;;  %p865_p1 = scmp.lt.s32.totalorder %s859_s20, %s859_s20 }
  0x3e   :  { %p866_p2 = por %p865_p1, %p864_p0 }
  0x40   :  { %p867_p3 = pnand %p866_p2, %p860_p13 }
  0x42   :  { %870 = shalt.err (!%p867_p3)
}
  0x43   :  { %64 = dma.hbm_to_vmem [thread:$0]  %s1090_s4, 1024, %s982_s26, [#allocation9], %s903_s9, %s903_s9, %s904_s10  }
  0x44   :  { %893 = dma.done.wait [#allocation3], 128  }
  0x45   :  { %894 = vsyncadd [#allocation3], 4294967168 }
  0x46   :  { %895 = dma.done.wait [#allocation6], 3072  }
  0x47   :  { %896 = vsyncadd [#allocation6], 4294964224 }
  0x48   :  { %897 = dma.done.wait [#allocation9], 1024  }
  0x49   :  { %898 = vsyncadd [#allocation9], 4294966272  ;;  %v907_v0 = vmov 0.0   ;;  %vm908_vm0 = vmmov 0   ;;  %v750_v1 = vld [vmem:[#allocation5] sm:$0xff]   ;;  %v751_v2 = vld [vmem:[#allocation5 + $0x8] sm:$0xff]  }
  0x4a   :  { %661 = vmatprep.subr.bf16.mxu0 %v907_v0  ;;  %677 = vmatprep.mubr.msk.bf16.mxu0 %vm908_vm0, %v907_v0  ;;  %v752_v3 = vld [vmem:[#allocation5 + $0x10] sm:$0xff]   ;;  %v759_v4 = vld [vmem:[#allocation7] sm:$0xff]   ;;  %v753_v5 = vld [vmem:[#allocation5 + $0x18] sm:$0xff]   ;;  %s909_s29 = smov [#allocation10]  }
  0x4b   :  { %681 = vmatprep.subr.bf16.mxu1 %v907_v0  ;;  %697 = vmatprep.mubr.msk.bf16.mxu1 %vm908_vm0, %v907_v0  ;;  %v760_v6 = vld [vmem:[#allocation7 + $0x8] sm:$0xff]   ;;  %v754_v7 = vld [vmem:[#allocation5 + $0x20] sm:$0xff]   ;;  %v761_v8 = vld [vmem:[#allocation7 + $0x10] sm:$0xff]   ;;  %s563_s30 = sshll.u32 %s909_s29, 4  ;;  %s564_s30 = int_to_ptr.vmem [resolvable:$true] %s563_s30 }
  0x4c   :  { %662 = vmatpush3.bf16.msra.mxu0 %v750_v1  ;;  %682 = vmatpush3.bf16.msra.mxu1 %v759_v4  ;;  %v755_v9 = vld [vmem:[#allocation5 + $0x28] sm:$0xff]   ;;  %v762_v10 = vld [vmem:[#allocation7 + $0x18] sm:$0xff]   ;;  %v756_v11 = vld [vmem:[#allocation5 + $0x30] sm:$0xff]   ;;  %p876_p5 = scmp.lt.s32.totalorder %s564_s30, %s564_s30 }
  0x4d   :  { %663 = vmatprep.subr.bf16.mxu0 %v907_v0  ;;  %683 = vmatprep.subr.bf16.mxu1 %v907_v0  ;;  %v763_v12 = vld [vmem:[#allocation7 + $0x20] sm:$0xff]   ;;  %v757_v13 = vld [vmem:[#allocation5 + $0x38] sm:$0xff]   ;;  %v764_v14 = vld [vmem:[#allocation7 + $0x28] sm:$0xff]  }
  0x4e   :  { %v758_v15 = vld [vmem:[#allocation2] sm:$0xff]   ;;  %v765_v16 = vld [vmem:[#allocation7 + $0x30] sm:$0xff]   ;;  %v767_v18 = vld [vmem:[#allocation7 + $0x40] sm:$0xff]  }
  0x4f   :  { %v766_v17 = vld [vmem:[#allocation7 + $0x38] sm:$0xff]   ;;  %v768_v19 = vld [vmem:[#allocation7 + $0x48] sm:$0xff]   ;;  %v769_v20 = vld [vmem:[#allocation7 + $0x50] sm:$0xff]  }
  0x50   :  { %664 = vmatpush3.bf16.msra.mxu0 %v751_v2  ;;  %684 = vmatpush3.bf16.msra.mxu1 %v760_v6  ;;  %v770_v21 = vld [vmem:[#allocation7 + $0x58] sm:$0xff]   ;;  %v771_v22 = vld [vmem:[#allocation7 + $0x60] sm:$0xff]   ;;  %v772_v23 = vld [vmem:[#allocation7 + $0x68] sm:$0xff]  }
  0x51   :  { %665 = vmatprep.subr.bf16.mxu0 %v907_v0  ;;  %685 = vmatprep.subr.bf16.mxu1 %v907_v0  ;;  %v577_v24 = vld [vmem:[%s1089_s3] ss:$0 sm:$0xff]  ;;  %v773_v34 = vld [vmem:[#allocation7 + $0x70] sm:$0xff]   ;;  %v775_v36 = vld [vmem:[#allocation8] sm:$0xff]  }
  0x52   :  { %v774_v35 = vld [vmem:[#allocation7 + $0x78] sm:$0xff]   ;;  %v776_v37 = vld [vmem:[#allocation8 + $0x8] sm:$0xff]   ;;  %v777_v38 = vld [vmem:[#allocation8 + $0x10] sm:$0xff]  }
  0x53   :  { %v778_v39 = vld [vmem:[#allocation8 + $0x18] sm:$0xff]   ;;  %v779_v40 = vld [vmem:[#allocation8 + $0x20] sm:$0xff]   ;;  %v780_v41 = vld [vmem:[#allocation8 + $0x28] sm:$0xff]  }
  0x54   :  { %666 = vmatpush3.bf16.msra.mxu0 %v752_v3  ;;  %686 = vmatpush3.bf16.msra.mxu1 %v761_v8  ;;  %v588_v42 = vld [vmem:[%s1089_s3 + $0x1] ss:$0 sm:$0xff]  ;;  %v781_v52 = vld [vmem:[#allocation8 + $0x30] sm:$0xff]   ;;  %v598_v54 = vld [vmem:[%s1089_s3 + $0x2] ss:$0 sm:$0xff]  ;;  %s871_s3 = scalar_lea.vmem %s564_s30, 128 }
  0x55   :  { %667 = vmatprep.subr.bf16.mxu0 %v907_v0  ;;  %687 = vmatprep.subr.bf16.mxu1 %v907_v0  ;;  %v782_v53 = vld [vmem:[#allocation8 + $0x38] sm:$0xff]   ;;  %p872_p4 = scmp.ne.s32.totalorder %s564_s30, %s871_s3  ;;  %p877_p6 = scmp.lt.s32.totalorder %s871_s3, %s871_s3 }
  0x57   :  { %p878_p7 = por %p877_p6, %p876_p5 }
  0x58   :  { %668 = vmatpush3.bf16.msra.mxu0 %v753_v5  ;;  %688 = vmatpush3.bf16.msra.mxu1 %v762_v10 }
  0x59   :  { %669 = vmatprep.subr.bf16.mxu0 %v907_v0  ;;  %689 = vmatprep.subr.bf16.mxu1 %v907_v0  ;;  %p879_p8 = pnand %p878_p7, %p872_p4 }
  0x5c   :  { %670 = vmatpush3.bf16.msra.mxu0 %v754_v7  ;;  %690 = vmatpush3.bf16.msra.mxu1 %v763_v12 }
  0x5d   :  { %671 = vmatprep.subr.bf16.mxu0 %v907_v0  ;;  %691 = vmatprep.subr.bf16.mxu1 %v907_v0 }
  0x60   :  { %672 = vmatpush3.bf16.msra.mxu0 %v755_v9  ;;  %692 = vmatpush3.bf16.msra.mxu1 %v764_v14 }
  0x61   :  { %673 = vmatprep.subr.bf16.mxu0 %v907_v0  ;;  %693 = vmatprep.subr.bf16.mxu1 %v907_v0 }
  0x64   :  { %674 = vmatpush3.bf16.msra.mxu0 %v756_v11  ;;  %694 = vmatpush3.bf16.msra.mxu1 %v765_v16 }
  0x65   :  { %675 = vmatprep.subr.bf16.mxu0 %v907_v0  ;;  %695 = vmatprep.subr.bf16.mxu1 %v907_v0 }
  0x68   :  { %676 = vmatpush3.bf16.msra.mxu0 %v757_v13  ;;  %696 = vmatpush3.bf16.msra.mxu1 %v766_v17 }
  0x69   :  { %701 = vmatprep.subr.bf16.mxu0 %v907_v0  ;;  %721 = vmatprep.subr.bf16.mxu1 %v907_v0 }
  0x6b   :  { %678 = vmatmul.mubr.bf16.vlgmr.msra.gmra.mrb[0].mxu0 %v758_v15 }
  0x6c   :  { %717 = vmatprep.mubr.msk.bf16.mxu0 %vm908_vm0, %v907_v0  ;;  %702 = vmatpush3.bf16.msra.mxu0 %v767_v18 }
  0x6d   :  { %703 = vmatprep.subr.bf16.mxu0 %v907_v0 }
  0x70   :  { %704 = vmatpush3.bf16.msra.mxu0 %v768_v19 }
  0x71   :  { %705 = vmatprep.subr.bf16.mxu0 %v907_v0 }
  0x74   :  { %706 = vmatpush3.bf16.msra.mxu0 %v769_v20 }
  0x75   :  { %707 = vmatprep.subr.bf16.mxu0 %v907_v0 }
  0x78   :  { %708 = vmatpush3.bf16.msra.mxu0 %v770_v21 }
  0x79   :  { %709 = vmatprep.subr.bf16.mxu0 %v907_v0 }
  0x7c   :  { %710 = vmatpush3.bf16.msra.mxu0 %v771_v22 }
  0x7d   :  { %711 = vmatprep.subr.bf16.mxu0 %v907_v0 }
  0x80   :  { %712 = vmatpush3.bf16.msra.mxu0 %v772_v23 }
  0x81   :  { %713 = vmatprep.subr.bf16.mxu0 %v907_v0 }
  0x84   :  { %714 = vmatpush3.bf16.msra.mxu0 %v773_v34 }
  0x85   :  { %715 = vmatprep.subr.bf16.mxu0 %v907_v0 }
  0x88   :  { %716 = vmatpush3.bf16.msra.mxu0 %v774_v35 }
 0x13e   :  { %v193_v25 = vpop.f32.mrb[0].mxu0 }
 0x13f   :  { %v194_v26 = vadd.f32 %v577_v24, %v193_v25  ;;  %v679_v27 = vpop.f32.mrb[1].mxu0 }
 0x140   :  { %v196_v28 = vpop.f32.mrb[2].mxu0 }
 0x141   :  { %v197_v29 = vadd.f32 %v577_v24, %v196_v28  ;;  %v680_v30 = vpop.f32.mrb[3].mxu0  ;;  %v200_v31 = vmax.f32 %v194_v26, 0.0 }
 0x143   :  { %v201_v32 = vmax.f32 %v197_v29, 0.0 }
 0x145   :  { %v202_v33 = vpack.c.bf16 %v201_v32, %v200_v31 }
 0x147   :  { %698 = vmatmul.mubr.bf16.vlgmr.msra.gmra.mrb[0].mxu1 %v202_v33 }
 0x148   :  { %737 = vmatprep.mubr.msk.bf16.mxu1 %vm908_vm0, %v907_v0  ;;  %722 = vmatpush3.bf16.msra.mxu1 %v775_v36 }
 0x149   :  { %723 = vmatprep.subr.bf16.mxu1 %v907_v0 }
 0x14c   :  { %724 = vmatpush3.bf16.msra.mxu1 %v776_v37 }
 0x14d   :  { %725 = vmatprep.subr.bf16.mxu1 %v907_v0 }
 0x150   :  { %726 = vmatpush3.bf16.msra.mxu1 %v777_v38 }
 0x151   :  { %727 = vmatprep.subr.bf16.mxu1 %v907_v0 }
 0x154   :  { %728 = vmatpush3.bf16.msra.mxu1 %v778_v39 }
 0x155   :  { %729 = vmatprep.subr.bf16.mxu1 %v907_v0 }
 0x158   :  { %730 = vmatpush3.bf16.msra.mxu1 %v779_v40 }
 0x159   :  { %731 = vmatprep.subr.bf16.mxu1 %v907_v0 }
 0x15c   :  { %732 = vmatpush3.bf16.msra.mxu1 %v780_v41 }
 0x15d   :  { %733 = vmatprep.subr.bf16.mxu1 %v907_v0 }
 0x160   :  { %734 = vmatpush3.bf16.msra.mxu1 %v781_v52 }
 0x161   :  { %735 = vmatprep.subr.bf16.mxu1 %v907_v0  ;;  %v607_v0 = vld [vmem:[%s1091_s5] ss:$0 sm:$0xff] }
 0x164   :  { %736 = vmatpush3.bf16.msra.mxu1 %v782_v53 }
 0x21a   :  { %v309_v43 = vpop.f32.mrb[0].mxu1 }
 0x21b   :  { %v310_v44 = vadd.f32 %v588_v42, %v309_v43  ;;  %v699_v45 = vpop.f32.mrb[1].mxu1 }
 0x21c   :  { %v312_v46 = vpop.f32.mrb[2].mxu1 }
 0x21d   :  { %v313_v47 = vadd.f32 %v588_v42, %v312_v46  ;;  %v700_v48 = vpop.f32.mrb[3].mxu1  ;;  %v316_v49 = vmax.f32 %v310_v44, 0.0 }
 0x21f   :  { %v317_v50 = vmax.f32 %v313_v47, 0.0 }
 0x221   :  { %v318_v51 = vpack.c.bf16 %v317_v50, %v316_v49 }
 0x223   :  { %718 = vmatmul.mubr.bf16.vlgmr.msra.gmra.mrb[4].mxu0 %v318_v51 }
 0x2f6   :  { %v426_v55 = vpop.f32.mrb[4].mxu0 }
 0x2f7   :  { %v427_v56 = vadd.f32 %v598_v54, %v426_v55  ;;  %v719_v57 = vpop.f32.mrb[5].mxu0 }
 0x2f8   :  { %v429_v58 = vpop.f32.mrb[6].mxu0 }
 0x2f9   :  { %v430_v59 = vadd.f32 %v598_v54, %v429_v58  ;;  %v720_v60 = vpop.f32.mrb[7].mxu0  ;;  %v433_v61 = vmax.f32 %v427_v56, 0.0 }
 0x2fb   :  { %v434_v62 = vmax.f32 %v430_v59, 0.0 }
 0x2fd   :  { %v435_v63 = vpack.c.bf16 %v434_v62, %v433_v61 }
 0x2ff   :  { %738 = vmatmul.mubr.bf16.vlgmr.msra.gmra.mrb[4].mxu1 %v435_v63 }
 0x3d2   :  { %v541_v1 = vpop.f32.mrb[4].mxu1 }
 0x3d3   :  { %v739_v2 = vpop.f32.mrb[5].mxu1  ;;  %v542_v4 = vadd.f32 %v607_v0, %v541_v1 }
 0x3d4   :  { %v544_v3 = vpop.f32.mrb[6].mxu1 }
 0x3d5   :  { %v545_v5 = vadd.f32 %v607_v0, %v544_v3  ;;  %v740_v6 = vpop.f32.mrb[7].mxu1 }
 0x3d7   :  { %v623_v7 = vpack.c.bf16 %v545_v5, %v542_v4 }
 0x3d9   :  { %624 = vst [vmem:[#allocation10] sm:$0xff] %v623_v7  }
 0x3da   :  { %882 = shalt.err (!%p879_p8)
}
 0x3db   :  { %s883_s8 = scalar_lea.hbm %s1092_s6, 128 }
 0x3dc   :  { %p884_p9 = scmp.ne.s32.totalorder %s1092_s6, %s883_s8  ;;  %p887_p10 = scmp.lt.u32.totalorder %s883_s8, %s1092_s6 }
 0x3de   :  { %p889_p11 = pnand %p887_p10, %p884_p9 }
 0x3e0   :  { %892 = shalt.err (!%p889_p11)
}
 0x3e1   :  { %569 = dma.vmem_to_hbm [thread:$0]  %s564_s30, 128, %s1092_s6, [#allocation4], %s903_s9, %s903_s9, %s904_s10  }
 0x3e2   :  { %899 = dma.done.wait [#allocation4], 128  }
 0x3e3   :  { %900 = vsyncadd [#allocation4], 4294967168 }
 0x3e4   :  { %573 = vsyncpa [#allocation3], 1 }
 0x3e5   :  { %574 = vsyncpa [#allocation6], 1 }
 0x3e6   :  { %575 = vsyncpa [#allocation9], 1 }
 0x3e7   :  { %576 = vsyncpa [#allocation4], 1 }

</bundles_post_ra>
